<compile_context>
chip_gen: v7x
topology: tpu7x:2x2x1
jax: 0.10.0
libtpu: 0.0.40
codegen_flags: <defaults>
</compile_context>

<pallas_src>
import jax
import jax.numpy as jnp
from jax.experimental import pallas as pl
from jax.experimental.pallas import tpu as pltpu


LANE = 128
MAX_BBLK = 16          # images per grid step (well under v7x 64 MiB VMEM)


def _round_up(n, m):
    return -(-n // m) * m


def _choose_bblk(batch):
    # Keep >= 2 grid steps when possible (one per TensorCore on v7x) and cap
    # the per-step block so VMEM stays comfortable on every generation.
    if batch <= 1:
        return 1
    return min(MAX_BBLK, max(1, batch // 2))


# ---------------------------------------------------------------------------
# Fused kernel: conv-as-patch-matmul (bf16 operands / f32 acc) + bias + ReLU
#               + global average pool + both linear heads, one packed store.
# One grid step == one batch block.
# ---------------------------------------------------------------------------
def deconf_fused_kernel(patch_ref, wconv_ref, bconv_ref, whead_ref, bhead_ref,
                        out_ref):
    cfp = wconv_ref.shape[1]                 # lane-padded feature width (128)
    bblk = out_ref.shape[1]                  # images in this block
    hw = patch_ref.shape[0] // bblk          # spatial positions per image
    inv_hw = 1.0 / hw

    # 3x3 conv as a single lane-packed patch matmul (K padded to 128).
    acc = jnp.dot(patch_ref[...], wconv_ref[...],
                  preferred_element_type=jnp.float32)        # (bblk*hw, 128) f32
    feat = jnp.maximum(acc + bconv_ref[...], 0.0)            # bias + ReLU

    # Global average pool: per-image column sum (VPU/XLU, no M=1 MXU push).
    z1 = jnp.sum(feat.reshape(bblk, hw, cfp), axis=1) * inv_hw   # (bblk, 128)

    # Both heads (fc and aux classifier) in one (bblk,128)@(128,256) matmul.
    heads = jnp.dot(z1.astype(jnp.bfloat16), whead_ref[...],
                    preferred_element_type=jnp.float32) + bhead_ref[...]

    # One packed lane-dense output: [ z1 | fc(z1) | z ].
    out_ref[0, :, :cfp] = z1
    out_ref[0, :, cfp:] = heads


# ---------------------------------------------------------------------------
# Wrapper: layout transforms, patch extraction, lane padding, single call.
# ---------------------------------------------------------------------------
def deconfnet_forward(x_nchw, params):
    B, C, H, W = x_nchw.shape
    c_feat = params["w_conv"].shape[1]
    n_cls = params["w_fc"].shape[1]
    hw = H * W

    cfp = _round_up(c_feat, LANE)            # 32  -> 128
    ncp = _round_up(n_cls, LANE)             # 10  -> 128
    kp = _round_up(9 * C, LANE)              # 36  -> 128
    out_width = cfp + 2 * ncp                # z1 | fc(z1) | z  (384 lanes)

    bblk = _choose_bblk(B)
    nblk = pl.cdiv(B, bblk)
    bp = nblk * bblk

    # NCHW -> NHWC, SAME pad, im2col patch matrix (bf16, lane-padded K).
    x = jnp.transpose(x_nchw, (0, 2, 3, 1))
    xp = jnp.pad(x, ((0, 0), (1, 1), (1, 1), (0, 0)))
    patches = jnp.concatenate(
        [xp[:, dh:dh + H, dw:dw + W, :] for dh in range(3) for dw in range(3)],
        axis=-1).reshape(B * hw, 9 * C)
    patches = jnp.pad(patches, ((0, (bp - B) * hw), (0, kp - 9 * C)))
    patches = patches.astype(jnp.bfloat16)

    # Parameters padded lane-dense; matmul operands in bf16 (f32 accumulation).
    wconv = jnp.zeros((kp, cfp), jnp.bfloat16).at[:9 * C, :c_feat].set(
        params["w_conv"].astype(jnp.bfloat16))
    bconv = jnp.zeros((1, cfp), jnp.float32).at[:, :c_feat].set(params["b_conv"])
    whead = jnp.zeros((cfp, 2 * ncp), jnp.bfloat16)
    whead = whead.at[:c_feat, :n_cls].set(params["w_fc"].astype(jnp.bfloat16))
    whead = whead.at[:c_feat, ncp:ncp + n_cls].set(
        params["w_cls"].astype(jnp.bfloat16))
    bhead = jnp.zeros((1, 2 * ncp), jnp.float32)
    bhead = bhead.at[:, :n_cls].set(params["b_fc"])
    bhead = bhead.at[:, ncp:ncp + n_cls].set(params["b_cls"])

    cost = pl.CostEstimate(
        flops=2 * bp * hw * kp * cfp + bp * hw * cfp + 2 * bp * cfp * 2 * ncp,
        transcendentals=0,
        bytes_accessed=(patches.size * 2 + wconv.size * 2 + whead.size * 2
                        + (bconv.size + bhead.size) * 4
                        + bp * out_width * 4),
    )

    packed = pl.pallas_call(
        deconf_fused_kernel,
        out_shape=jax.ShapeDtypeStruct((nblk, bblk, out_width), jnp.float32),
        grid=(nblk,),
        in_specs=[
            pl.BlockSpec((bblk * hw, kp), lambda b: (b, 0)),     # patch block
            pl.BlockSpec((kp, cfp), lambda b: (0, 0)),           # resident weights
            pl.BlockSpec((1, cfp), lambda b: (0, 0)),
            pl.BlockSpec((cfp, 2 * ncp), lambda b: (0, 0)),
            pl.BlockSpec((1, 2 * ncp), lambda b: (0, 0)),
        ],
        out_specs=pl.BlockSpec((1, bblk, out_width), lambda b: (b, 0, 0)),
        compiler_params=pltpu.CompilerParams(
            dimension_semantics=("parallel",),        # 2 TCs on v7x get a block each
            vmem_limit_bytes=32 * 1024 * 1024,        # safe on v5e/v6e/v7x
        ),
        cost_estimate=cost,
    )(patches, wconv, bconv, whead, bhead)

    packed = packed.reshape(bp, out_width)[:B]
    z1 = packed[:, :c_feat]
    out = packed[:, cfp:cfp + n_cls]
    z = packed[:, cfp + ncp:cfp + ncp + n_cls]
    # DeconfNet.forward returns fc(z1); z1 and z are kept as side attributes.
    return out, (z1, z)


# ---------------------------------------------------------------------------
# Pure-JAX reference (f32) for the correctness check.
# ---------------------------------------------------------------------------
def deconfnet_reference(x_nchw, params, kh=3, kw=3):
    B, C, H, W = x_nchw.shape
    x = jnp.transpose(x_nchw, (0, 2, 3, 1))
    c_feat = params["w_conv"].shape[1]
    w_hwio = params["w_conv"].reshape(kh, kw, C, c_feat)
    y = jax.lax.conv_general_dilated(
        x, w_hwio, window_strides=(1, 1), padding="SAME",
        dimension_numbers=("NHWC", "HWIO", "NHWC"))
    y = jnp.maximum(y + params["b_conv"].reshape(1, 1, 1, c_feat), 0.0)
    z1 = jnp.mean(y.reshape(B, H * W, c_feat), axis=1)
    z = z1 @ params["w_cls"] + params["b_cls"]
    out = z1 @ params["w_fc"] + params["b_fc"]
    return out, (z1, z)


if __name__ == "__main__":
    B, C, H, W = 2, 4, 16, 16       # small shapes consistent with an image input
    C_FEAT = 32                     # backbone feature width
    NUM_CLASSES = 10

    key = jax.random.PRNGKey(0)
    kx, kwc, kbc, kwl, kbl, kwf, kbf = jax.random.split(key, 7)

    x = jax.random.normal(kx, (B, C, H, W), dtype=jnp.float32)

    params = {
        # conv filters stored already flattened as (kh*kw*cin, cout)
        "w_conv": (jax.random.normal(kwc, (3 * 3 * C, C_FEAT), jnp.float32) * 0.1),
        "b_conv": (jax.random.normal(kbc, (1, C_FEAT), jnp.float32) * 0.1),
        # underlying model's auxiliary classifier producing z
        "w_cls": (jax.random.normal(kwl, (C_FEAT, NUM_CLASSES), jnp.float32) * 0.1),
        "b_cls": (jax.random.normal(kbl, (1, NUM_CLASSES), jnp.float32) * 0.1),
        # deconf head h == self.fc
        "w_fc": (jax.random.normal(kwf, (C_FEAT, NUM_CLASSES), jnp.float32) * 0.1),
        "b_fc": (jax.random.normal(kbf, (1, NUM_CLASSES), jnp.float32) * 0.1),
    }

    fwd = jax.jit(deconfnet_forward)
    out, (z1, z) = fwd(x, params)
    jax.block_until_ready(out)

    ref_out, (ref_z1, ref_z) = deconfnet_reference(x, params)
    assert out.shape == (B, NUM_CLASSES)
    assert z1.shape == (B, C_FEAT) and z.shape == (B, NUM_CLASSES)
    # Tolerance accounts for bf16 MXU operands (f32 accumulation).
    assert jnp.allclose(out, ref_out, rtol=2e-2, atol=2e-2)
    assert jnp.allclose(z1, ref_z1, rtol=2e-2, atol=2e-2)
    assert jnp.allclose(z, ref_z, rtol=2e-2, atol=2e-2)

    print("KERNEL_OK")
</pallas_src>

<mosaic_0001>
module attributes {stable_mosaic.version = 11 : i64} {
  func.func @deconf_fused_kernel(%arg0: i32, %arg1: memref<256x128xbf16, #tpu.memory_space<vmem>>, %arg2: memref<128x128xbf16, #tpu.memory_space<vmem>>, %arg3: memref<1x128xf32, #tpu.memory_space<vmem>>, %arg4: memref<128x256xbf16, #tpu.memory_space<vmem>>, %arg5: memref<1x256xf32, #tpu.memory_space<vmem>>, %arg6: memref<1x1x384xf32, #tpu.memory_space<vmem>>) attributes {dimension_semantics = [#tpu.dimension_semantics<parallel>], iteration_bounds = array<i64: 2>, scalar_prefetch = 0 : i64, scratch_operands = 0 : i64, tpu.core_type = #tpu.core_type<tc>, window_params = [{transform_indices = @transform_0, window_bounds = array<i64: 256, 128>}, {pipeline_mode = #tpu.pipeline_mode<synchronous>, transform_indices = @transform_1, window_bounds = array<i64: 128, 128>}, {pipeline_mode = #tpu.pipeline_mode<synchronous>, transform_indices = @transform_2, window_bounds = array<i64: 1, 128>}, {pipeline_mode = #tpu.pipeline_mode<synchronous>, transform_indices = @transform_3, window_bounds = array<i64: 128, 256>}, {pipeline_mode = #tpu.pipeline_mode<synchronous>, transform_indices = @transform_4, window_bounds = array<i64: 1, 256>}, {transform_indices = @transform_5, window_bounds = array<i64: 1, 1, 384>}]} {
    %c0 = arith.constant 0 : index
    %c0_0 = arith.constant 0 : index
    %0 = vector.load %arg1[%c0, %c0_0] : memref<256x128xbf16, #tpu.memory_space<vmem>>, vector<256x128xbf16>
    %c0_1 = arith.constant 0 : index
    %c0_2 = arith.constant 0 : index
    %1 = vector.load %arg2[%c0_1, %c0_2] : memref<128x128xbf16, #tpu.memory_space<vmem>>, vector<128x128xbf16>
    %cst = arith.constant dense<0.000000e+00> : vector<256x128xf32>
    %2 = tpu.matmul %0, %1, %cst {dimension_numbers = #tpu.dot_dimension_numbers<[1], [0], [0], [1], [0, 0, 1, 1], [], []>} : vector<256x128xbf16>, vector<128x128xbf16>, vector<256x128xf32> -> vector<256x128xf32>
    %c0_3 = arith.constant 0 : index
    %c0_4 = arith.constant 0 : index
    %3 = vector.load %arg3[%c0_3, %c0_4] : memref<1x128xf32, #tpu.memory_space<vmem>>, vector<1x128xf32>
    %4 = vector.broadcast %3 : vector<1x128xf32> to vector<256x128xf32>
    %5 = arith.addf %2, %4 : vector<256x128xf32>
    %cst_5 = arith.constant 0.000000e+00 : f32
    %6 = vector.broadcast %cst_5 : f32 to vector<256x128xf32>
    %7 = arith.maximumf %5, %6 : vector<256x128xf32>
    %8 = vector.shape_cast %7 : vector<256x128xf32> to vector<1x256x128xf32>
    %cst_6 = arith.constant dense<0.000000e+00> : vector<1x128xf32>
    %9 = vector.multi_reduction <add>, %8, %cst_6 [1] : vector<1x256x128xf32> to vector<1x128xf32>
    %cst_7 = arith.constant 3.906250e-03 : f32
    %10 = vector.broadcast %cst_7 : f32 to vector<1x128xf32>
    %11 = arith.mulf %9, %10 : vector<1x128xf32>
    %12 = arith.truncf %11 : vector<1x128xf32> to vector<1x128xbf16>
    %c0_8 = arith.constant 0 : index
    %c0_9 = arith.constant 0 : index
    %13 = vector.load %arg4[%c0_8, %c0_9] : memref<128x256xbf16, #tpu.memory_space<vmem>>, vector<128x256xbf16>
    %cst_10 = arith.constant dense<0.000000e+00> : vector<1x256xf32>
    %14 = tpu.matmul %12, %13, %cst_10 {dimension_numbers = #tpu.dot_dimension_numbers<[1], [0], [0], [1], [0, 0, 1, 1], [], []>} : vector<1x128xbf16>, vector<128x256xbf16>, vector<1x256xf32> -> vector<1x256xf32>
    %c0_11 = arith.constant 0 : index
    %c0_12 = arith.constant 0 : index
    %15 = vector.load %arg5[%c0_11, %c0_12] : memref<1x256xf32, #tpu.memory_space<vmem>>, vector<1x256xf32>
    %16 = arith.addf %14, %15 : vector<1x256xf32>
    %c0_13 = arith.constant 0 : index
    %c0_14 = arith.constant 0 : index
    %c0_15 = arith.constant 0 : index
    %17 = vector.load %arg6[%c0_13, %c0_14, %c0_15] : memref<1x1x384xf32, #tpu.memory_space<vmem>>, vector<1x1x128xf32>
    %18 = vector.shape_cast %17 : vector<1x1x128xf32> to vector<1x128xf32>
    %19 = vector.shape_cast %11 : vector<1x128xf32> to vector<1x1x128xf32>
    tpu.vector_store %arg6[%c0_13, %c0_14, %c0_15], %19 {strides = array<i32>} : memref<1x1x384xf32, #tpu.memory_space<vmem>>, vector<1x1x128xf32>,
    %c0_16 = arith.constant 0 : index
    %c0_17 = arith.constant 0 : index
    %c128 = arith.constant 128 : index
    %20 = vector.load %arg6[%c0_16, %c0_17, %c128] : memref<1x1x384xf32, #tpu.memory_space<vmem>>, vector<1x1x256xf32>
    %21 = vector.shape_cast %20 : vector<1x1x256xf32> to vector<1x256xf32>
    %22 = vector.shape_cast %16 : vector<1x256xf32> to vector<1x1x256xf32>
    tpu.vector_store %arg6[%c0_16, %c0_17, %c128], %22 {strides = array<i32>} : memref<1x1x384xf32, #tpu.memory_space<vmem>>, vector<1x1x256xf32>,
    return
  }
  func.func @transform_0(%arg0: i32) -> (i32, i32) {
    %c0_i32 = arith.constant 0 : i32
    %c0_i32_0 = arith.constant 0 : i32
    return %arg0, %c0_i32 : i32, i32
  }
  func.func @transform_1(%arg0: i32) -> (i32, i32) {
    %c0_i32 = arith.constant 0 : i32
    %c0_i32_0 = arith.constant 0 : i32
    %c0_i32_1 = arith.constant 0 : i32
    return %c0_i32, %c0_i32_0 : i32, i32
  }
  func.func @transform_2(%arg0: i32) -> (i32, i32) {
    %c0_i32 = arith.constant 0 : i32
    %c0_i32_0 = arith.constant 0 : i32
    %c0_i32_1 = arith.constant 0 : i32
    return %c0_i32, %c0_i32_0 : i32, i32
  }
  func.func @transform_3(%arg0: i32) -> (i32, i32) {
    %c0_i32 = arith.constant 0 : i32
    %c0_i32_0 = arith.constant 0 : i32
    %c0_i32_1 = arith.constant 0 : i32
    return %c0_i32, %c0_i32_0 : i32, i32
  }
  func.func @transform_4(%arg0: i32) -> (i32, i32) {
    %c0_i32 = arith.constant 0 : i32
    %c0_i32_0 = arith.constant 0 : i32
    %c0_i32_1 = arith.constant 0 : i32
    return %c0_i32, %c0_i32_0 : i32, i32
  }
  func.func @transform_5(%arg0: i32) -> (i32, i32, i32) {
    %c0_i32 = arith.constant 0 : i32
    %c0_i32_0 = arith.constant 0 : i32
    %c0_i32_1 = arith.constant 0 : i32
    return %arg0, %c0_i32, %c0_i32_0 : i32, i32, i32
  }
}

</mosaic_0001>

<bundles_post_ra>
// kernel: deconfnet_forward.1
= control target key start
LH: loop header
LB: loop body
LE: loop exit
PB: predicated region body
PF: predicated region fallthrough
CT: control target
= control target key end

     0   :  { %s1106_s18 = smov 0   ;;  %s1258_s0 = inlined_call_operand.vmem [shape: bf16[512,128], index: 0, kind: input, shape index: {}]   ;;  %s1259_s1 = inlined_call_operand.vmem [shape: bf16[128,128], index: 1, kind: input, shape index: {}]   ;;  %s1260_s2 = inlined_call_operand.vmem [shape: f32[1,128], index: 2, kind: input, shape index: {}]   ;;  %s1261_s3 = inlined_call_operand.vmem [shape: bf16[128,256], index: 3, kind: input, shape index: {}]   ;;  %s1262_s4 = inlined_call_operand.vmem [shape: f32[1,256], index: 4, kind: input, shape index: {}]   ;;  %s1263_s5 = inlined_call_operand.vmem [shape: f32[2,1,384], index: 5, kind: output, shape index: {}]  }
   0x1 LB: > { %s1112_s19 = sadd.s32 4294967295, %s1072_s18   ;;  %p889_p0 = scmp.ge.s32.totalorder %s1072_s18, 1  ;;  %s1072_s18 = sphi %s1106_s18, %s15_s18  }
   0x2   : > { %p188_p1 = scmp.lt.s32.totalorder %s1072_s18, 3 }
   0x4   : > { %p189_p2 = pnand %p889_p0, %p188_p1 }
   0x5   : > { %v1018_v0 = vld [vmem:[%s1259_s1] sm:$0xff] (!%p189_p2)   ;;  %s890_s22 = sshll.u32 (!%p189_p2), %s1112_s19, 5  ;;  %v1019_v1 = vld [vmem:[%s1259_s1 + $0x8] sm:$0xff] (!%p189_p2)   ;;  %v1020_v2 = vld [vmem:[%s1259_s1 + $0x10] sm:$0xff] (!%p189_p2)   ;;  %v1074_v38 = vmov (!%p189_p2), 0   ;;  %p221_p4 = scmp.lt.s32.totalorder (!%p189_p2), %s1112_s19, 1 }
   0x6   : > { %192 = sbr.rel (%p189_p2) target bundleno = 557 (0x22d), region = 40  ;;  %p216_p3 = scmp.lt.s32.totalorder (!%p189_p2), %s890_s22, 63  ;;  %959 = vmatprep.subr.bf16.mxu0 (!%p189_p2), %v1018_v0  ;;  %v1021_v3 = vld [vmem:[%s1259_s1 + $0x18] sm:$0xff] (!%p189_p2)   ;;  %v1022_v5 = vld [vmem:[%s1259_s1 + $0x20] sm:$0xff] (!%p189_p2)   ;;  %v1023_v6 = vld [vmem:[%s1259_s1 + $0x28] sm:$0xff] (!%p189_p2)   ;;  %797 = vmatprep.mubr.bf16.mxu1 (!%p189_p2), %v1074_v38 }
   0x7   : > { %960 = vmatpush3.bf16.msra.mxu0 (!%p189_p2), %v1018_v0  ;;  %v1024_v7 = vld [vmem:[%s1259_s1 + $0x30] sm:$0xff] (!%p189_p2)   ;;  %v1025_v8 = vld [vmem:[%s1259_s1 + $0x38] sm:$0xff] (!%p189_p2)   ;;  %v1042_v24 = vld [vmem:[%s1261_s3 + $0x4] ss:$8 sps:$4 sm:$0xff] (!%p189_p2)  }
   0x8   : > { %961 = vmatprep.subr.bf16.mxu0 (!%p189_p2), %v1019_v1  ;;  %v1044_v25 = vld [vmem:[%s1261_s3] ss:$8 sps:$4 sm:$0xff] (!%p189_p2)   ;;  %765 = vmatprep.subr.bf16.mxu1 (!%p189_p2), %v1042_v24  ;;  %v1045_v26 = vld [vmem:[%s1261_s3 + $0x14] ss:$8 sps:$4 sm:$0xff] (!%p189_p2)   ;;  %v1047_v27 = vld [vmem:[%s1261_s3 + $0x10] ss:$8 sps:$4 sm:$0xff] (!%p189_p2)  }
   0x9   : > { %766 = vmatpush1.bf16.msra.mxu1 (!%p189_p2), %v1044_v25  ;;  %v1048_v28 = vld [vmem:[%s1261_s3 + $0x24] ss:$8 sps:$4 sm:$0xff] (!%p189_p2)   ;;  %v1050_v29 = vld [vmem:[%s1261_s3 + $0x20] ss:$8 sps:$4 sm:$0xff] (!%p189_p2)   ;;  %v1051_v30 = vld [vmem:[%s1261_s3 + $0x34] ss:$8 sps:$4 sm:$0xff] (!%p189_p2)  }
   0xa   : > { %767 = vmatprep.subr.bf16.mxu1 (!%p189_p2), %v1045_v26  ;;  %v1053_v31 = vld [vmem:[%s1261_s3 + $0x30] ss:$8 sps:$4 sm:$0xff] (!%p189_p2)   ;;  %v1054_v32 = vld [vmem:[%s1261_s3 + $0x44] ss:$8 sps:$4 sm:$0xff] (!%p189_p2)   ;;  %v1056_v33 = vld [vmem:[%s1261_s3 + $0x40] ss:$8 sps:$4 sm:$0xff] (!%p189_p2)  }
   0xb   : > { %962 = vmatpush3.bf16.msra.mxu0 (!%p189_p2), %v1019_v1  ;;  %v1057_v34 = vld [vmem:[%s1261_s3 + $0x54] ss:$8 sps:$4 sm:$0xff] (!%p189_p2)   ;;  %v1059_v35 = vld [vmem:[%s1261_s3 + $0x50] ss:$8 sps:$4 sm:$0xff] (!%p189_p2)   ;;  %v1060_v36 = vld [vmem:[%s1261_s3 + $0x64] ss:$8 sps:$4 sm:$0xff] (!%p189_p2)  }
   0xc   : > { %963 = vmatprep.subr.bf16.mxu0 (!%p189_p2), %v1020_v2  ;;  %v1062_v37 = vld [vmem:[%s1261_s3 + $0x60] ss:$8 sps:$4 sm:$0xff] (!%p189_p2)   ;;  %v1063_v39 = vld [vmem:[%s1261_s3 + $0x74] ss:$8 sps:$4 sm:$0xff] (!%p189_p2)   ;;  %v1065_v40 = vld [vmem:[%s1261_s3 + $0x70] ss:$8 sps:$4 sm:$0xff] (!%p189_p2)  }
   0xd   : > { %s1265_s22 = smov (!%p216_p3, %s890_s22), 63  ;;  %768 = vmatpush1.bf16.msra.mxu1 %v1047_v27  ;;  %v1213_v41 = vld [vmem:[%s1260_s2] ss:$0 sm:$0xff]  ;;  %s1267_s19 = smov (!%p221_p4, %s1112_s19), 1 }
   0xe   : > { %s891_s27 = sshll.u32 %s1265_s22, 2  ;;  %769 = vmatprep.subr.bf16.mxu1 %v1048_v28  ;;  %s1007_s29 = smul.u32 3, %s1267_s19 }
   0xf   : > { %s1129_s30 = scalar_lea.vmem %s1258_s0, %s891_s27  ;;  %964 = vmatpush3.bf16.msra.mxu0 %v1020_v2 }
  0x10   : > { %v1026_v4 = vld [vmem:[%s1129_s30] sm:$0xff]   ;;  %965 = vmatprep.subr.bf16.mxu0 %v1021_v3  ;;  %v1027_v9 = vld [vmem:[%s1129_s30 + $0x8] sm:$0xff]   ;;  %v1028_v10 = vld [vmem:[%s1129_s30 + $0x10] sm:$0xff]   ;;  %s224_s7 = scalar_lea.vmem %s1263_s5, %s1007_s29 }
  0x11   : > { %975 = vmatprep.mubr.bf16.mxu0 %v1026_v4  ;;  %v1029_v11 = vld [vmem:[%s1129_s30 + $0x18] sm:$0xff]   ;;  %v1030_v12 = vld [vmem:[%s1129_s30 + $0x20] sm:$0xff]   ;;  %v1031_v13 = vld [vmem:[%s1129_s30 + $0x28] sm:$0xff]   ;;  %770 = vmatpush1.bf16.msra.mxu1 %v1050_v29 }
  0x12   : > { %v1032_v14 = vld [vmem:[%s1129_s30 + $0x30] sm:$0xff]   ;;  %v1033_v15 = vld [vmem:[%s1129_s30 + $0x38] sm:$0xff]   ;;  %v1034_v16 = vld [vmem:[%s1129_s30 + $0x40] sm:$0xff]   ;;  %771 = vmatprep.subr.bf16.mxu1 %v1051_v30 }
  0x13   : > { %966 = vmatpush3.bf16.msra.mxu0 %v1021_v3  ;;  %v1035_v17 = vld [vmem:[%s1129_s30 + $0x48] sm:$0xff]   ;;  %v1036_v18 = vld [vmem:[%s1129_s30 + $0x50] sm:$0xff]   ;;  %v1037_v19 = vld [vmem:[%s1129_s30 + $0x58] sm:$0xff]  }
  0x14   : > { %967 = vmatprep.subr.bf16.mxu0 %v1022_v5  ;;  %v1038_v20 = vld [vmem:[%s1129_s30 + $0x60] sm:$0xff]   ;;  %v1039_v21 = vld [vmem:[%s1129_s30 + $0x68] sm:$0xff]   ;;  %v1040_v22 = vld [vmem:[%s1129_s30 + $0x70] sm:$0xff]  }
  0x15   : > { %v1041_v23 = vld [vmem:[%s1129_s30 + $0x78] sm:$0xff]   ;;  %772 = vmatpush1.bf16.msra.mxu1 %v1053_v31 }
  0x16   : > { %773 = vmatprep.subr.bf16.mxu1 %v1054_v32 }
  0x17   : > { %968 = vmatpush3.bf16.msra.mxu0 %v1022_v5 }
  0x18   : > { %969 = vmatprep.subr.bf16.mxu0 %v1023_v6 }
  0x19   : > { %774 = vmatpush1.bf16.msra.mxu1 %v1056_v33 }
  0x1a   : > { %775 = vmatprep.subr.bf16.mxu1 %v1057_v34 }
  0x1b   : > { %970 = vmatpush3.bf16.msra.mxu0 %v1023_v6 }
  0x1c   : > { %971 = vmatprep.subr.bf16.mxu0 %v1024_v7 }
  0x1d   : > { %776 = vmatpush1.bf16.msra.mxu1 %v1059_v35 }
  0x1e   : > { %777 = vmatprep.subr.bf16.mxu1 %v1060_v36 }
  0x1f   : > { %972 = vmatpush3.bf16.msra.mxu0 %v1024_v7 }
  0x20   : > { %973 = vmatprep.subr.bf16.mxu0 %v1025_v8 }
  0x21   : > { %778 = vmatpush1.bf16.msra.mxu1 %v1062_v37 }
  0x22   : > { %779 = vmatprep.subr.bf16.mxu1 %v1063_v39 }
  0x23   : > { %974 = vmatpush3.bf16.msra.mxu0 %v1025_v8 }
  0x25   : > { %780 = vmatpush1.bf16.msra.mxu1 %v1065_v40 }
  0x26   : > { %976 = vmatmul.mubr.bf16.vlgmr.msra.gmra.mrb[0].mxu0 %v1027_v9 }
  0x27   : > { %979 = vmatprep.mubr.bf16.mxu0 %v1028_v10 }
  0x2e   : > { %980 = vmatmul.mubr.bf16.gmra.mrb[4].mxu0 %v1029_v11 }
  0x2f   : > { %983 = vmatprep.mubr.bf16.mxu0 %v1030_v12 }
  0x36   : > { %984 = vmatmul.mubr.bf16.gmra.mrb[8].mxu0 %v1031_v13 }
  0x37   : > { %987 = vmatprep.mubr.bf16.mxu0 %v1032_v14 }
  0x3e   : > { %988 = vmatmul.mubr.bf16.gmra.mrb[12].mxu0 %v1033_v15 }
  0x3f   : > { %991 = vmatprep.mubr.bf16.mxu0 %v1034_v16 }
  0x46   : > { %992 = vmatmul.mubr.bf16.gmra.mrb[16].mxu0 %v1035_v17 }
  0x47   : > { %995 = vmatprep.mubr.bf16.mxu0 %v1036_v18 }
  0x4e   : > { %996 = vmatmul.mubr.bf16.gmra.mrb[20].mxu0 %v1037_v19 }
  0x4f   : > { %999 = vmatprep.mubr.bf16.mxu0 %v1038_v20 }
  0x56   : > { %1000 = vmatmul.mubr.bf16.gmra.mrb[24].mxu0 %v1039_v21 }
  0x57   : > { %1003 = vmatprep.mubr.bf16.mxu0 %v1040_v22 }
  0x5e   : > { %1004 = vmatmul.mubr.bf16.gmra.mrb[28].mxu0 %v1041_v23 }
  0xf9   : > { %v977_v42 = vpop.f32.mrb[0].mxu0 }
  0xfa   : > { %v459_v43 = vpop.f32.mrb[1].mxu0  ;;  %v468_v47 = vadd.f32 %v977_v42, %v1213_v41 }
  0xfb   : > { %v460_v44 = vadd.f32 %v1213_v41, %v459_v43  ;;  %v978_v45 = vpop.f32.mrb[2].mxu0 }
  0xfc   : > { %v462_v46 = vpop.f32.mrb[3].mxu0  ;;  %v471_v50 = vadd.f32 %v978_v45, %v1213_v41  ;;  %v588_v52 = vmax.f32 %v468_v47, 0.0 }
  0xfd   : > { %v463_v48 = vadd.f32 %v1213_v41, %v462_v46  ;;  %v586_v49 = vmax.f32 %v460_v44, 0.0 }
  0xfe   : > { %v589_v56 = vmax.f32 %v471_v50, 0.0 }
  0xff   : > { %v587_v51 = vmax.f32 %v463_v48, 0.0 }
 0x101   : > { %v618_v53 = vadd.f32 %v587_v51, %v586_v49  ;;  %v981_v54 = vpop.f32.mrb[4].mxu0 }
 0x102   : > { %v475_v55 = vpop.f32.mrb[5].mxu0  ;;  %v484_v61 = vadd.f32 %v981_v54, %v1213_v41 }
 0x103   : > { %v619_v57 = vadd.f32 %v618_v53, %v588_v52  ;;  %v476_v58 = vadd.f32 %v1213_v41, %v475_v55  ;;  %v982_v59 = vpop.f32.mrb[6].mxu0 }
 0x104   : > { %v478_v60 = vpop.f32.mrb[7].mxu0  ;;  %v487_v2 = vadd.f32 %v982_v59, %v1213_v41  ;;  %v592_v4 = vmax.f32 %v484_v61, 0.0 }
 0x105   : > { %v590_v62 = vmax.f32 %v476_v58, 0.0  ;;  %v620_v63 = vadd.f32 %v619_v57, %v589_v56  ;;  %v479_v0 = vadd.f32 %v1213_v41, %v478_v60 }
 0x106   : > { %v593_v8 = vmax.f32 %v487_v2, 0.0 }
 0x107   : > { %v621_v1 = vadd.f32 %v620_v63, %v590_v62  ;;  %v591_v3 = vmax.f32 %v479_v0, 0.0 }
 0x109   : > { %v622_v5 = vadd.f32 %v621_v1, %v591_v3  ;;  %v985_v6 = vpop.f32.mrb[8].mxu0 }
 0x10a   : > { %v491_v7 = vpop.f32.mrb[9].mxu0  ;;  %v500_v13 = vadd.f32 %v985_v6, %v1213_v41 }
 0x10b   : > { %v623_v9 = vadd.f32 %v622_v5, %v592_v4  ;;  %v492_v10 = vadd.f32 %v1213_v41, %v491_v7  ;;  %v986_v11 = vpop.f32.mrb[10].mxu0 }
 0x10c   : > { %v494_v12 = vpop.f32.mrb[11].mxu0  ;;  %v503_v18 = vadd.f32 %v986_v11, %v1213_v41  ;;  %v596_v20 = vmax.f32 %v500_v13, 0.0 }
 0x10d   : > { %v594_v14 = vmax.f32 %v492_v10, 0.0  ;;  %v624_v15 = vadd.f32 %v623_v9, %v593_v8  ;;  %v495_v16 = vadd.f32 %v1213_v41, %v494_v12 }
 0x10e   : > { %v597_v24 = vmax.f32 %v503_v18, 0.0 }
 0x10f   : > { %v625_v17 = vadd.f32 %v624_v15, %v594_v14  ;;  %v595_v19 = vmax.f32 %v495_v16, 0.0 }
 0x111   : > { %v626_v21 = vadd.f32 %v625_v17, %v595_v19  ;;  %v989_v22 = vpop.f32.mrb[12].mxu0 }
 0x112   : > { %v507_v23 = vpop.f32.mrb[13].mxu0  ;;  %v516_v29 = vadd.f32 %v989_v22, %v1213_v41 }
 0x113   : > { %v627_v25 = vadd.f32 %v626_v21, %v596_v20  ;;  %v508_v26 = vadd.f32 %v1213_v41, %v507_v23  ;;  %v990_v27 = vpop.f32.mrb[14].mxu0 }
 0x114   : > { %v510_v28 = vpop.f32.mrb[15].mxu0  ;;  %v519_v34 = vadd.f32 %v990_v27, %v1213_v41  ;;  %v600_v36 = vmax.f32 %v516_v29, 0.0 }
 0x115   : > { %v598_v30 = vmax.f32 %v508_v26, 0.0  ;;  %v628_v31 = vadd.f32 %v627_v25, %v597_v24  ;;  %v511_v32 = vadd.f32 %v1213_v41, %v510_v28 }
 0x116   : > { %v601_v40 = vmax.f32 %v519_v34, 0.0 }
 0x117   : > { %v629_v33 = vadd.f32 %v628_v31, %v598_v30  ;;  %v599_v35 = vmax.f32 %v511_v32, 0.0 }
 0x119   : > { %v630_v37 = vadd.f32 %v629_v33, %v599_v35  ;;  %v993_v38 = vpop.f32.mrb[16].mxu0 }
 0x11a   : > { %v523_v39 = vpop.f32.mrb[17].mxu0  ;;  %v532_v46 = vadd.f32 %v993_v38, %v1213_v41 }
 0x11b   : > { %v631_v42 = vadd.f32 %v630_v37, %v600_v36  ;;  %v524_v43 = vadd.f32 %v1213_v41, %v523_v39  ;;  %v994_v44 = vpop.f32.mrb[18].mxu0 }
 0x11c   : > { %v526_v45 = vpop.f32.mrb[19].mxu0  ;;  %v535_v51 = vadd.f32 %v994_v44, %v1213_v41  ;;  %v604_v53 = vmax.f32 %v532_v46, 0.0 }
 0x11d   : > { %v602_v47 = vmax.f32 %v524_v43, 0.0  ;;  %v632_v48 = vadd.f32 %v631_v42, %v601_v40  ;;  %v527_v49 = vadd.f32 %v1213_v41, %v526_v45 }
 0x11e   : > { %v605_v57 = vmax.f32 %v535_v51, 0.0 }
 0x11f   : > { %v633_v50 = vadd.f32 %v632_v48, %v602_v47  ;;  %v603_v52 = vmax.f32 %v527_v49, 0.0  ;;  %v755_v47 = vlaneseq }
 0x121   : > { %v634_v54 = vadd.f32 %v633_v50, %v603_v52  ;;  %v997_v55 = vpop.f32.mrb[20].mxu0  ;;  %vm808_vm0 = vcmp.lt.s32.totalorder %v755_v47, 128  ;;  %v756_v51 = vshrl.u32 %v755_v47, 7  ;;  %vm829_vm1 = vcmp.lt.s32.totalorder %v755_v47, 256 }
 0x122   : > { %v539_v56 = vpop.f32.mrb[21].mxu0  ;;  %v548_v62 = vadd.f32 %v997_v55, %v1213_v41  ;;  %v1075_v55 = vmov 1966171168  }
 0x123   : > { %v635_v58 = vadd.f32 %v634_v54, %v604_v53  ;;  %v540_v59 = vadd.f32 %v1213_v41, %v539_v56  ;;  %v998_v60 = vpop.f32.mrb[22].mxu0  ;;  %v757_v52 = vsub.s32 0, %v756_v51  ;;  %v673_v53 = vld [vmem:[%s1262_s4] sm:$0x3]  ;;  %v761_v54 = vsub.s32 1, %v756_v51 }
 0x124   : > { %v542_v61 = vpop.f32.mrb[23].mxu0  ;;  %v551_v3 = vadd.f32 %v998_v60, %v1213_v41  ;;  %v608_v5 = vmax.f32 %v548_v62, 0.0  ;;  %v815_v56 = vunpack.c.l.s4 %v1075_v55 }
 0x125   : > { %v606_v63 = vmax.f32 %v540_v59, 0.0  ;;  %v636_v0 = vadd.f32 %v635_v58, %v605_v57  ;;  %v543_v1 = vadd.f32 %v1213_v41, %v542_v61  ;;  %v758_v57 = vrot.slane %v673_v53, %v757_v52 }
 0x126   : > { %v609_v9 = vmax.f32 %v551_v3, 0.0  ;;  %v762_v58 = vrot.slane %v673_v53, %v761_v54  ;;  %v816_v59 = vunpack.c.0.s8 %v815_v56 }
 0x127   : > { %v637_v2 = vadd.f32 %v636_v0, %v606_v63  ;;  %v607_v4 = vmax.f32 %v543_v1, 0.0 }
 0x128   : > { %v819_v0 = vsub.s32 %v816_v59, %v756_v51 }
 0x129   : > { %v638_v6 = vadd.f32 %v637_v2, %v607_v4  ;;  %v1001_v7 = vpop.f32.mrb[24].mxu0 }
 0x12a   : > { %v555_v8 = vpop.f32.mrb[25].mxu0  ;;  %v564_v14 = vadd.f32 %v1001_v7, %v1213_v41 }
 0x12b   : > { %v639_v10 = vadd.f32 %v638_v6, %v608_v5  ;;  %v556_v11 = vadd.f32 %v1213_v41, %v555_v8  ;;  %v1002_v12 = vpop.f32.mrb[26].mxu0 }
 0x12c   : > { %v558_v13 = vpop.f32.mrb[27].mxu0  ;;  %v567_v19 = vadd.f32 %v1002_v12, %v1213_v41  ;;  %v612_v21 = vmax.f32 %v564_v14, 0.0 }
 0x12d   : > { %v610_v15 = vmax.f32 %v556_v11, 0.0  ;;  %v640_v16 = vadd.f32 %v639_v10, %v609_v9  ;;  %v559_v17 = vadd.f32 %v1213_v41, %v558_v13 }
 0x12e   : > { %v613_v25 = vmax.f32 %v567_v19, 0.0 }
 0x12f   : > { %v641_v18 = vadd.f32 %v640_v16, %v610_v15  ;;  %v611_v20 = vmax.f32 %v559_v17, 0.0 }
 0x131   : > { %v642_v22 = vadd.f32 %v641_v18, %v611_v20  ;;  %v1005_v23 = vpop.f32.mrb[28].mxu0 }
 0x132   : > { %v571_v24 = vpop.f32.mrb[29].mxu0  ;;  %v580_v30 = vadd.f32 %v1005_v23, %v1213_v41 }
 0x133   : > { %v643_v26 = vadd.f32 %v642_v22, %v612_v21  ;;  %v572_v27 = vadd.f32 %v1213_v41, %v571_v24  ;;  %v1006_v28 = vpop.f32.mrb[30].mxu0 }
 0x134   : > { %v574_v29 = vpop.f32.mrb[31].mxu0  ;;  %v583_v35 = vadd.f32 %v1006_v28, %v1213_v41  ;;  %v616_v37 = vmax.f32 %v580_v30, 0.0 }
 0x135   : > { %v614_v31 = vmax.f32 %v572_v27, 0.0  ;;  %v644_v32 = vadd.f32 %v643_v26, %v613_v25  ;;  %v575_v33 = vadd.f32 %v1213_v41, %v574_v29 }
 0x136   : > { %v617_v39 = vmax.f32 %v583_v35, 0.0 }
 0x137   : > { %v645_v34 = vadd.f32 %v644_v32, %v614_v31  ;;  %v615_v36 = vmax.f32 %v575_v33, 0.0 }
 0x139   : > { %v646_v38 = vadd.f32 %v645_v34, %v615_v36 }
 0x13b   : > { %v647_v40 = vadd.f32 %v646_v38, %v616_v37 }
 0x13d   : > { %v648_v42 = vadd.f32 %v647_v40, %v617_v39 }
 0x13f   : > { %v649_v43 = vrot.slane %v648_v42, 4 }
 0x141   : > { %v650_v44 = vadd.f32 %v649_v43, %v648_v42 }
 0x143   : > { %v651_v45 = vrot.slane %v650_v44, 2 }
 0x145   : > { %v652_v46 = vadd.f32 %v651_v45, %v650_v44 }
 0x147   : > { %v653_v48 = vrot.slane %v652_v46, 1 }
 0x149   : > { %v654_v49 = vadd.f32 %v653_v48, %v652_v46 }
 0x14b   : > { %v655_v41 = vmul.f32 0.00390625, %v654_v49 }
 0x14d   : > { %v656_v50 = vpack.c.bf16 %v655_v41, %v655_v41  ;;  %810 = vst.msk [vmem:[%s224_s7] sm:$0x1] %vm808_vm0, %v655_v41 }
 0x14f   : > { %798 = vmatmul.mubr.bf16.vlgmr.msra.gmra.mrb[0].mxu1 %v656_v50 }
 0x222   : > { %v799_v60 = vpop.f32.mrb[0].mxu1 }
 0x223   : > { %v800_v61 = vadd.f32 %v799_v60, %v758_v57  ;;  %v801_v62 = vpop.f32.mrb[1].mxu1 }
 0x224   : > { %v802_v63 = vadd.f32 %v801_v62, %v762_v58  ;;  %v803_v1 = vpop.f32.mrb[2].mxu1 }
 0x225   : > { %v804_v2 = vpop.f32.mrb[3].mxu1 }
 0x226   : > { %v813_v3 = vcombine.low %v800_v61, %v802_v63 }
 0x228   : > { %v820_v4 = vrot.slane %v813_v3, %v819_v0 }
 0x22a   : > { %v827_v5 = vrot.slane %v820_v4, %v819_v0 }
 0x22c   : > { %831 = vst.msk [vmem:[%s224_s7 + $0x1] sm:$0x3] %vm829_vm1, %v827_v5 }
 0x22d PF: > { %s15_s18 = sadd.s32 1, %s1072_s18  }
 0x22e   : > { %p12_p5 = scmp.ge.s32.totalorder %s15_s18, 4  }
 0x230   :  { %14 = sbr.rel (!%p12_p5) target bundleno = 1 (0x1), region = 70 }

</bundles_post_ra>
